<compile_context>
chip_gen: v7x
topology: tpu7x:2x2x1
jax: 0.10.0
libtpu: 0.0.40
codegen_flags: <defaults>
</compile_context>

<pallas_src>
import functools

import jax
import jax.numpy as jnp
from jax import lax
from jax.experimental import pallas as pl
from jax.experimental.pallas import tpu as pltpu


# ---------------------------------------------------------------------------
# Single fused kernel: whole generator forward pass
# ---------------------------------------------------------------------------
def _fused_fc_kernel(*refs, n_blocks, matmul_dtype):
    """Ref layout:
         refs[0]                 : z          (B, latent_dim)
         block 0                 : w, b                       (Linear + LeakyReLU, no norm)
         blocks 1 .. n_blocks-1  : w, b, gamma, beta          (Linear + BN(batch stats) + LeakyReLU)
         final                   : w, b                       (Linear + Tanh)
         refs[-1]                : out        (B, out_size*out_size)
    """
    z_ref = refs[0]
    o_ref = refs[-1]
    p = list(refs[1:-1])

    def linear(x, w_ref, b_ref):
        w = w_ref[...]
        if matmul_dtype != jnp.float32:
            # bf16 MXU inputs (v6e/v7x lever); accumulate in f32.
            x = x.astype(matmul_dtype)
            w = w.astype(matmul_dtype)
        return jnp.dot(x, w, preferred_element_type=jnp.float32) + b_ref[...]

    idx = 0
    x = z_ref[...].astype(jnp.float32)
    for blk in range(n_blocks):
        if blk == 0:
            w_ref, b_ref = p[idx], p[idx + 1]
            idx += 2
            y = linear(x, w_ref, b_ref)
        else:
            w_ref, b_ref, g_ref, be_ref = p[idx], p[idx + 1], p[idx + 2], p[idx + 3]
            idx += 4
            y = linear(x, w_ref, b_ref)
            # BatchNorm1d (training-mode batch stats), single-pass var, gamma folded into scale.
            # NOTE: valid because the whole batch is resident in this one kernel invocation;
            # if the batch dim is ever tiled over a grid, a cross-tile reduction is required.
            mean = jnp.mean(y, axis=0, keepdims=True)
            mean_sq = jnp.mean(y * y, axis=0, keepdims=True)
            var = jnp.maximum(mean_sq - mean * mean, 0.0)
            scale = g_ref[...] * lax.rsqrt(var + 1e-5)
            y = (y - mean) * scale + be_ref[...]
        x = jnp.where(y > 0, y, 0.2 * y)  # LeakyReLU(0.2)

    wf_ref, bf_ref = p[idx], p[idx + 1]
    y = linear(x, wf_ref, bf_ref)
    o_ref[...] = jnp.tanh(y).astype(o_ref.dtype)


# ---------------------------------------------------------------------------
# Wrapper: one pallas_call for the whole forward pass, everything VMEM-resident
# ---------------------------------------------------------------------------
def vanilla_fc_forward(z, params, out_size, output_nch, matmul_dtype=jnp.float32):
    """z: (B, latent_dim) -> (B, output_nch, out_size, out_size)."""
    B = z.shape[0]
    n_out = out_size * out_size

    flat_inputs = [z]
    for i, blk in enumerate(params["blocks"]):
        flat_inputs += [blk["w"], blk["b"]]
        if i > 0:
            flat_inputs += [blk["gamma"], blk["beta"]]
    flat_inputs += [params["final_w"], params["final_b"]]

    kernel = functools.partial(
        _fused_fc_kernel,
        n_blocks=len(params["blocks"]),
        matmul_dtype=matmul_dtype,
    )

    vmem_spec = pl.BlockSpec(memory_space=pltpu.MemorySpace.VMEM)
    out = pl.pallas_call(
        kernel,
        out_shape=jax.ShapeDtypeStruct((B, n_out), jnp.float32),
        in_specs=[vmem_spec] * len(flat_inputs),
        out_specs=vmem_spec,
    )(*flat_inputs)

    # torch: x.view(B, output_nch, out_size, out_size)
    # TODO(synk): as in the torch module, this view is only consistent when output_nch == 1.
    return out.reshape(B, output_nch, out_size, out_size)


# ---------------------------------------------------------------------------
# Parameter init (matches torch layer shapes; Linear weights stored as (in, out))
# ---------------------------------------------------------------------------
def init_params(key, latent_dim, n_layers, out_size):
    """PyTorch-default-like Linear init U(-1/sqrt(in), 1/sqrt(in)); BN gamma=1, beta=0."""
    # TODO(synk): `norm_modules[norm_module_name]` is undefined in the source; assumed BatchNorm1d.
    dims = [latent_dim] + list(n_layers)
    params = {"blocks": []}
    for i in range(len(n_layers)):
        k_in, k_out = dims[i], dims[i + 1]
        key, kw, kb = jax.random.split(key, 3)
        bound = 1.0 / (k_in ** 0.5)
        w = jax.random.uniform(kw, (k_in, k_out), jnp.float32, -bound, bound)
        b = jax.random.uniform(kb, (1, k_out), jnp.float32, -bound, bound)
        if i == 0:
            params["blocks"].append({"w": w, "b": b, "gamma": None, "beta": None})
        else:
            params["blocks"].append(
                {
                    "w": w,
                    "b": b,
                    "gamma": jnp.ones((1, k_out), jnp.float32),
                    "beta": jnp.zeros((1, k_out), jnp.float32),
                }
            )
    k_in, k_out = dims[-1], out_size * out_size
    key, kw, kb = jax.random.split(key, 3)
    bound = 1.0 / (k_in ** 0.5)
    params["final_w"] = jax.random.uniform(kw, (k_in, k_out), jnp.float32, -bound, bound)
    params["final_b"] = jax.random.uniform(kb, (1, k_out), jnp.float32, -bound, bound)
    return params


if __name__ == "__main__":
    # Small config consistent with the module:
    # VanillaFCModule(out_size=16, n_layers="64,128", output_nch=1, latent_dim=32, norm_module_name="bn")
    B = 2
    latent_dim = 32
    n_layers = [64, 128]
    out_size = 16
    output_nch = 1  # final Linear outputs out_size*out_size, so nch must be 1 for the view to hold

    key = jax.random.PRNGKey(0)
    key, kz = jax.random.split(key)
    z = jax.random.normal(kz, (B, latent_dim), jnp.float32)

    params = init_params(key, latent_dim, n_layers, out_size)

    out = vanilla_fc_forward(z, params, out_size, output_nch)
    out = jax.block_until_ready(out)

    assert out.shape == (B, output_nch, out_size, out_size), out.shape
    assert bool(jnp.all(jnp.isfinite(out)))
    assert bool(jnp.all(jnp.abs(out) <= 1.0 + 1e-6))  # tanh output range
    print("KERNEL_OK")
</pallas_src>

<mosaic_0001>
module attributes {stable_mosaic.version = 11 : i64} {
  func.func @_fused_fc_kernel(%arg0: memref<2x32xf32, #tpu.memory_space<vmem>>, %arg1: memref<32x64xf32, #tpu.memory_space<vmem>>, %arg2: memref<1x64xf32, #tpu.memory_space<vmem>>, %arg3: memref<64x128xf32, #tpu.memory_space<vmem>>, %arg4: memref<1x128xf32, #tpu.memory_space<vmem>>, %arg5: memref<1x128xf32, #tpu.memory_space<vmem>>, %arg6: memref<1x128xf32, #tpu.memory_space<vmem>>, %arg7: memref<128x256xf32, #tpu.memory_space<vmem>>, %arg8: memref<1x256xf32, #tpu.memory_space<vmem>>, %arg9: memref<2x256xf32, #tpu.memory_space<vmem>>) attributes {dimension_semantics = [], scalar_prefetch = 0 : i64, scratch_operands = 0 : i64, tpu.core_type = #tpu.core_type<tc>} {
    %c0 = arith.constant 0 : index
    %c0_0 = arith.constant 0 : index
    %0 = vector.load %arg0[%c0, %c0_0] : memref<2x32xf32, #tpu.memory_space<vmem>>, vector<2x32xf32>
    %c0_1 = arith.constant 0 : index
    %c0_2 = arith.constant 0 : index
    %1 = vector.load %arg1[%c0_1, %c0_2] : memref<32x64xf32, #tpu.memory_space<vmem>>, vector<32x64xf32>
    %cst = arith.constant dense<0.000000e+00> : vector<2x64xf32>
    %2 = tpu.matmul %0, %1, %cst {dimension_numbers = #tpu.dot_dimension_numbers<[1], [0], [0], [1], [0, 0, 1, 1], [], []>} : vector<2x32xf32>, vector<32x64xf32>, vector<2x64xf32> -> vector<2x64xf32>
    %c0_3 = arith.constant 0 : index
    %c0_4 = arith.constant 0 : index
    %3 = vector.load %arg2[%c0_3, %c0_4] : memref<1x64xf32, #tpu.memory_space<vmem>>, vector<1x64xf32>
    %4 = vector.broadcast %3 : vector<1x64xf32> to vector<2x64xf32>
    %5 = arith.addf %2, %4 : vector<2x64xf32>
    %cst_5 = arith.constant 0.000000e+00 : f32
    %6 = vector.broadcast %cst_5 : f32 to vector<2x64xf32>
    %7 = arith.cmpf ogt, %5, %6 : vector<2x64xf32>
    %cst_6 = arith.constant 2.000000e-01 : f32
    %8 = vector.broadcast %cst_6 : f32 to vector<2x64xf32>
    %9 = arith.mulf %8, %5 : vector<2x64xf32>
    %10 = arith.select %7, %5, %9 : vector<2x64xi1>, vector<2x64xf32>
    %c0_7 = arith.constant 0 : index
    %c0_8 = arith.constant 0 : index
    %11 = vector.load %arg3[%c0_7, %c0_8] : memref<64x128xf32, #tpu.memory_space<vmem>>, vector<64x128xf32>
    %cst_9 = arith.constant dense<0.000000e+00> : vector<2x128xf32>
    %12 = tpu.matmul %10, %11, %cst_9 {dimension_numbers = #tpu.dot_dimension_numbers<[1], [0], [0], [1], [0, 0, 1, 1], [], []>} : vector<2x64xf32>, vector<64x128xf32>, vector<2x128xf32> -> vector<2x128xf32>
    %c0_10 = arith.constant 0 : index
    %c0_11 = arith.constant 0 : index
    %13 = vector.load %arg4[%c0_10, %c0_11] : memref<1x128xf32, #tpu.memory_space<vmem>>, vector<1x128xf32>
    %14 = vector.broadcast %13 : vector<1x128xf32> to vector<2x128xf32>
    %15 = arith.addf %12, %14 : vector<2x128xf32>
    %cst_12 = arith.constant dense<0.000000e+00> : vector<128xf32>
    %16 = vector.multi_reduction <add>, %15, %cst_12 [0] : vector<2x128xf32> to vector<128xf32>
    %17 = vector.shape_cast %16 : vector<128xf32> to vector<1x128xf32>
    %cst_13 = arith.constant 2.000000e+00 : f32
    %18 = vector.broadcast %cst_13 : f32 to vector<1x128xf32>
    %19 = arith.divf %17, %18 : vector<1x128xf32>
    %20 = arith.mulf %15, %15 : vector<2x128xf32>
    %cst_14 = arith.constant dense<0.000000e+00> : vector<128xf32>
    %21 = vector.multi_reduction <add>, %20, %cst_14 [0] : vector<2x128xf32> to vector<128xf32>
    %22 = vector.shape_cast %21 : vector<128xf32> to vector<1x128xf32>
    %cst_15 = arith.constant 2.000000e+00 : f32
    %23 = vector.broadcast %cst_15 : f32 to vector<1x128xf32>
    %24 = arith.divf %22, %23 : vector<1x128xf32>
    %25 = arith.mulf %19, %19 : vector<1x128xf32>
    %26 = arith.subf %24, %25 : vector<1x128xf32>
    %cst_16 = arith.constant 0.000000e+00 : f32
    %27 = vector.broadcast %cst_16 : f32 to vector<1x128xf32>
    %28 = arith.maximumf %26, %27 : vector<1x128xf32>
    %c0_17 = arith.constant 0 : index
    %c0_18 = arith.constant 0 : index
    %29 = vector.load %arg5[%c0_17, %c0_18] : memref<1x128xf32, #tpu.memory_space<vmem>>, vector<1x128xf32>
    %cst_19 = arith.constant 9.99999974E-6 : f32
    %30 = vector.broadcast %cst_19 : f32 to vector<1x128xf32>
    %31 = arith.addf %28, %30 : vector<1x128xf32>
    %32 = math.rsqrt %31 : vector<1x128xf32>
    %33 = arith.mulf %29, %32 : vector<1x128xf32>
    %34 = vector.broadcast %19 : vector<1x128xf32> to vector<2x128xf32>
    %35 = arith.subf %15, %34 : vector<2x128xf32>
    %36 = vector.broadcast %33 : vector<1x128xf32> to vector<2x128xf32>
    %37 = arith.mulf %35, %36 : vector<2x128xf32>
    %c0_20 = arith.constant 0 : index
    %c0_21 = arith.constant 0 : index
    %38 = vector.load %arg6[%c0_20, %c0_21] : memref<1x128xf32, #tpu.memory_space<vmem>>, vector<1x128xf32>
    %39 = vector.broadcast %38 : vector<1x128xf32> to vector<2x128xf32>
    %40 = arith.addf %37, %39 : vector<2x128xf32>
    %cst_22 = arith.constant 0.000000e+00 : f32
    %41 = vector.broadcast %cst_22 : f32 to vector<2x128xf32>
    %42 = arith.cmpf ogt, %40, %41 : vector<2x128xf32>
    %cst_23 = arith.constant 2.000000e-01 : f32
    %43 = vector.broadcast %cst_23 : f32 to vector<2x128xf32>
    %44 = arith.mulf %43, %40 : vector<2x128xf32>
    %45 = arith.select %42, %40, %44 : vector<2x128xi1>, vector<2x128xf32>
    %c0_24 = arith.constant 0 : index
    %c0_25 = arith.constant 0 : index
    %46 = vector.load %arg7[%c0_24, %c0_25] : memref<128x256xf32, #tpu.memory_space<vmem>>, vector<128x256xf32>
    %cst_26 = arith.constant dense<0.000000e+00> : vector<2x256xf32>
    %47 = tpu.matmul %45, %46, %cst_26 {dimension_numbers = #tpu.dot_dimension_numbers<[1], [0], [0], [1], [0, 0, 1, 1], [], []>} : vector<2x128xf32>, vector<128x256xf32>, vector<2x256xf32> -> vector<2x256xf32>
    %c0_27 = arith.constant 0 : index
    %c0_28 = arith.constant 0 : index
    %48 = vector.load %arg8[%c0_27, %c0_28] : memref<1x256xf32, #tpu.memory_space<vmem>>, vector<1x256xf32>
    %49 = vector.broadcast %48 : vector<1x256xf32> to vector<2x256xf32>
    %50 = arith.addf %47, %49 : vector<2x256xf32>
    %51 = math.tanh %50 : vector<2x256xf32>
    %c0_29 = arith.constant 0 : index
    %c0_30 = arith.constant 0 : index
    %52 = vector.load %arg9[%c0_29, %c0_30] : memref<2x256xf32, #tpu.memory_space<vmem>>, vector<2x256xf32>
    tpu.vector_store %arg9[%c0_29, %c0_30], %51 {strides = array<i32>} : memref<2x256xf32, #tpu.memory_space<vmem>>, vector<2x256xf32>,
    return
  }
}

</mosaic_0001>

<bundles_post_ra>
// kernel: tpu_custom_call.1
= control target key start
LH: loop header
LB: loop body
LE: loop exit
PB: predicated region body
PF: predicated region fallthrough
CT: control target
= control target key end

     0   :  { %14 = vsyncpa [#allocation3], 0  ;;  %s836_s0 = inlined_call_operand.hbm [shape: f32[2,32], index: 0, kind: input, shape index: {}]   ;;  %s837_s1 = inlined_call_operand.hbm [shape: f32[32,64], index: 1, kind: input, shape index: {}]   ;;  %s838_s2 = inlined_call_operand.vmem [shape: f32[1,64], index: 2, kind: input, shape index: {}]   ;;  %s839_s3 = inlined_call_operand.hbm [shape: f32[64,128], index: 3, kind: input, shape index: {}]   ;;  %s840_s4 = inlined_call_operand.vmem [shape: f32[1,128], index: 4, kind: input, shape index: {}]   ;;  %s841_s5 = inlined_call_operand.vmem [shape: f32[1,128], index: 5, kind: input, shape index: {}]   ;;  %s842_s6 = inlined_call_operand.vmem [shape: f32[1,128], index: 6, kind: input, shape index: {}]   ;;  %s843_s7 = inlined_call_operand.hbm [shape: f32[128,256], index: 7, kind: input, shape index: {}]   ;;  %s844_s8 = inlined_call_operand.vmem [shape: f32[1,256], index: 8, kind: input, shape index: {}]   ;;  %s845_s9 = inlined_call_operand.hbm [shape: f32[2,256], index: 9, kind: output, shape index: {}]  }
   0x1   :  { %15 = vsyncpa [#allocation6], 0 }
   0x2   :  { %16 = vsyncpa [#allocation9], 0 }
   0x3   :  { %17 = vsyncpa [#allocation4], 0  ;;  %s691_s30 = smov [#allocation5]   ;;  %s573_s13 = scalar_lea.hbm %s837_s1, 512 }
   0x4   :  { %s33_s10 = sshll.u32 %s691_s30, 4  ;;  %p574_p0 = scmp.ne.s32.totalorder %s837_s1, %s573_s13  ;;  %s34_s10 = int_to_ptr.vmem [resolvable:$true] %s33_s10 }
   0x5   :  { %p577_p1 = scmp.lt.u32.totalorder %s573_s13, %s837_s1 }
   0x7   :  { %p579_p2 = pnand %p577_p1, %p574_p0 }
   0x9   :  { %582 = shalt.err (!%p579_p2)
}
   0xa   :  { %s583_s18 = scalar_lea.vmem %s34_s10, 512  ;;  %p588_p4 = scmp.lt.s32.totalorder %s34_s10, %s34_s10 }
   0xb   :  { %p584_p3 = scmp.ne.s32.totalorder %s34_s10, %s583_s18  ;;  %p589_p5 = scmp.lt.s32.totalorder %s583_s18, %s583_s18 }
   0xd   :  { %p590_p6 = por %p589_p5, %p588_p4 }
   0xf   :  { %p591_p7 = pnand %p590_p6, %p584_p3 }
  0x11   :  { %594 = shalt.err (!%p591_p7)
}
  0x12   :  { %s692_s19 = smov 128   ;;  %s693_s20 = smov 8  }
  0x13   :  { %39 = dma.hbm_to_vmem [thread:$0]  %s837_s1, 512, %s34_s10, [#allocation6], %s692_s19, %s692_s19, %s693_s20  }
  0x14   :  { %s694_s23 = smov [#allocation2]   ;;  %s695_s25 = smov [#allocation7]  }
  0x15   :  { %s24_s24 = sshll.u32 %s694_s23, 4  ;;  %s47_s26 = sshll.u32 %s695_s25, 4  ;;  %s25_s24 = int_to_ptr.vmem [resolvable:$true] %s24_s24  ;;  %s48_s26 = int_to_ptr.vmem [resolvable:$true] %s47_s26 }
  0x16   :  { %s595_s29 = scalar_lea.hbm %s836_s0, 32 }
  0x17   :  { %p596_p8 = scmp.ne.s32.totalorder %s836_s0, %s595_s29  ;;  %p599_p9 = scmp.lt.u32.totalorder %s595_s29, %s836_s0 }
  0x19   :  { %p601_p10 = pnand %p599_p9, %p596_p8 }
  0x1b   :  { %604 = shalt.err (!%p601_p10)
}
  0x1c   :  { %s605_s1 = scalar_lea.vmem %s25_s24, 32  ;;  %p610_p12 = scmp.lt.s32.totalorder %s25_s24, %s25_s24 }
  0x1d   :  { %p606_p11 = scmp.ne.s32.totalorder %s25_s24, %s605_s1  ;;  %p611_p13 = scmp.lt.s32.totalorder %s605_s1, %s605_s1 }
  0x1f   :  { %p612_p0 = por %p611_p13, %p610_p12 }
  0x21   :  { %p613_p1 = pnand %p612_p0, %p606_p11 }
  0x23   :  { %616 = shalt.err (!%p613_p1)
}
  0x24   :  { %27 = dma.hbm_to_vmem [thread:$0]  %s836_s0, 32, %s25_s24, [#allocation3]  }
  0x25   :  { %s617_s17 = scalar_lea.hbm %s839_s3, 1024 }
  0x26   :  { %p618_p2 = scmp.ne.s32.totalorder %s839_s3, %s617_s17  ;;  %p621_p3 = scmp.lt.u32.totalorder %s617_s17, %s839_s3 }
  0x28   :  { %p623_p4 = pnand %p621_p3, %p618_p2 }
  0x2a   :  { %626 = shalt.err (!%p623_p4)
}
  0x2b   :  { %s627_s25 = scalar_lea.vmem %s48_s26, 1024  ;;  %p632_p6 = scmp.lt.s32.totalorder %s48_s26, %s48_s26 }
  0x2c   :  { %p628_p5 = scmp.ne.s32.totalorder %s48_s26, %s627_s25  ;;  %p633_p7 = scmp.lt.s32.totalorder %s627_s25, %s627_s25 }
  0x2e   :  { %p634_p8 = por %p633_p7, %p632_p6 }
  0x30   :  { %p635_p9 = pnand %p634_p8, %p628_p5 }
  0x32   :  { %638 = shalt.err (!%p635_p9)
}
  0x33   :  { %53 = dma.hbm_to_vmem [thread:$0]  %s839_s3, 1024, %s48_s26, [#allocation6], %s692_s19, %s692_s19, %s693_s20  }
  0x34   :  { %s696_s27 = smov [#allocation8]   ;;  %s639_s11 = scalar_lea.hbm %s843_s7, 4096 }
  0x35   :  { %s65_s28 = sshll.u32 %s696_s27, 4  ;;  %p640_p10 = scmp.ne.s32.totalorder %s843_s7, %s639_s11  ;;  %s66_s28 = int_to_ptr.vmem [resolvable:$true] %s65_s28 }
  0x36   :  { %p643_p11 = scmp.lt.u32.totalorder %s639_s11, %s843_s7 }
  0x38   :  { %p645_p12 = pnand %p643_p11, %p640_p10 }
  0x3a   :  { %648 = shalt.err (!%p645_p12)
}
  0x3b   :  { %s649_s14 = scalar_lea.vmem %s66_s28, 4096  ;;  %p654_p0 = scmp.lt.s32.totalorder %s66_s28, %s66_s28 }
  0x3c   :  { %p650_p13 = scmp.ne.s32.totalorder %s66_s28, %s649_s14  ;;  %p655_p1 = scmp.lt.s32.totalorder %s649_s14, %s649_s14 }
  0x3e   :  { %p656_p2 = por %p655_p1, %p654_p0 }
  0x40   :  { %p657_p3 = pnand %p656_p2, %p650_p13 }
  0x42   :  { %660 = shalt.err (!%p657_p3)
}
  0x43   :  { %s697_s3 = smov 256   ;;  %s698_s19 = smov 16  }
  0x44   :  { %71 = dma.hbm_to_vmem [thread:$0]  %s843_s7, 4096, %s66_s28, [#allocation9], %s697_s3, %s697_s3, %s698_s19  }
  0x45   :  { %683 = dma.done.wait [#allocation3], 32  }
  0x46   :  { %684 = vsyncadd [#allocation3], 4294967264 }
  0x47   :  { %685 = dma.done.wait [#allocation6], 1536  }
  0x48   :  { %686 = vsyncadd [#allocation6], 4294965760 }
  0x49   :  { %687 = dma.done.wait [#allocation9], 4096  }
  0x4a   :  { %688 = vsyncadd [#allocation9], 4294963200  ;;  %v699_v0 = vmov 0.0|0.0   ;;  %vm700_vm0 = vmmov 0   ;;  %v701_v1 = vmov 0.0   ;;  %v87_v2 = vld [vmem:[#allocation5] sm:$0xff] }
  0x4b   :  { %505 = vmatprep.subr.bf16.mxu1 %v699_v0  ;;  %483 = vmatprep.mubr.msk.f32.mxu1 %vm700_vm0, %v701_v1  ;;  %v88_v3 = vld [vmem:[#allocation5 + $0x8] sm:$0xff]  ;;  %v89_v4 = vld [vmem:[#allocation5 + $0x10] sm:$0xff]  ;;  %v90_v6 = vld [vmem:[#allocation5 + $0x18] sm:$0xff]  ;;  %vm98_vm1 = vcmask 261120   ;;  %vm190_vm3 = vcmask 523264   ;;  %vm264_vm4 = vcmask 1041408  }
  0x4c   :  { %417 = vmatprep.mubr.f32.mxu0 %v701_v1  ;;  %v506_v5 = vpack.c.bf16 %v88_v3, %v87_v2  ;;  %v509_v7 = vpack.c.bf16 %v90_v6, %v89_v4  ;;  %v175_v8 = vld [vmem:[#allocation7] sm:$0xff]  ;;  %v176_v9 = vld [vmem:[#allocation7 + $0x8] sm:$0xff]  ;;  %v86_v10 = vld [vmem:[#allocation2] sm:$0x3] }
  0x4d   :  { %v512_v11 = vpack.c.bf16 %v176_v9, %v175_v8  ;;  %v177_v12 = vld [vmem:[#allocation7 + $0x10] sm:$0xff]  ;;  %v178_v13 = vld [vmem:[#allocation7 + $0x18] sm:$0xff]  ;;  %v179_v15 = vld [vmem:[#allocation7 + $0x20] sm:$0xff] }
  0x4e   :  { %507 = vmatpush3.bf16.msra.mxu1 %v506_v5  ;;  %v515_v14 = vpack.c.bf16 %v178_v13, %v177_v12  ;;  %v180_v16 = vld [vmem:[#allocation7 + $0x28] sm:$0xff]  ;;  %v181_v18 = vld [vmem:[#allocation7 + $0x30] sm:$0xff]  ;;  %v182_v19 = vld [vmem:[#allocation7 + $0x38] sm:$0xff] }
  0x4f   :  { %508 = vmatprep.subr.bf16.mxu1 %v699_v0  ;;  %v518_v17 = vpack.c.bf16 %v180_v16, %v179_v15  ;;  %v521_v20 = vpack.c.bf16 %v182_v19, %v181_v18  ;;  %v455_v21 = vld [vmem:[%s838_s2] ss:$0 sm:$0xff]  ;;  %v310_v27 = vld [vmem:[#allocation8 + $0x8] sm:$0xff]  ;;  %v309_v30 = vld [vmem:[#allocation8] sm:$0xff] }
  0x50   :  { %v312_v28 = vld [vmem:[#allocation8 + $0x18] sm:$0xff]  ;;  %v311_v31 = vld [vmem:[#allocation8 + $0x10] sm:$0xff]  ;;  %v314_v33 = vld [vmem:[#allocation8 + $0x28] sm:$0xff] }
  0x51   :  { %v523_v29 = vpack.c.bf16 %v312_v28, %v310_v27  ;;  %v525_v32 = vpack.c.bf16 %v311_v31, %v309_v30  ;;  %v316_v34 = vld [vmem:[#allocation8 + $0x38] sm:$0xff]  ;;  %v313_v36 = vld [vmem:[#allocation8 + $0x20] sm:$0xff]  ;;  %v315_v37 = vld [vmem:[#allocation8 + $0x30] sm:$0xff] }
  0x52   :  { %510 = vmatpush3.bf16.msra.mxu1 %v509_v7  ;;  %v527_v35 = vpack.c.bf16 %v316_v34, %v314_v33  ;;  %v529_v38 = vpack.c.bf16 %v315_v37, %v313_v36  ;;  %v318_v39 = vld [vmem:[#allocation8 + $0x48] sm:$0xff]  ;;  %v320_v40 = vld [vmem:[#allocation8 + $0x58] sm:$0xff]  ;;  %v317_v42 = vld [vmem:[#allocation8 + $0x40] sm:$0xff]  ;;  %v292_v36 = vlaneseq }
  0x53   :  { %511 = vmatprep.subr.bf16.mxu1 %v699_v0  ;;  %524 = vmatprep.subr.bf16.mxu0 %v523_v29  ;;  %v531_v41 = vpack.c.bf16 %v320_v40, %v318_v39  ;;  %v319_v43 = vld [vmem:[#allocation8 + $0x50] sm:$0xff]  ;;  %v322_v45 = vld [vmem:[#allocation8 + $0x68] sm:$0xff]  ;;  %v324_v46 = vld [vmem:[#allocation8 + $0x78] sm:$0xff] }
  0x54   :  { %526 = vmatpush1.bf16.msra.mxu0 %v525_v32  ;;  %v533_v44 = vpack.c.bf16 %v319_v43, %v317_v42  ;;  %v535_v47 = vpack.c.bf16 %v324_v46, %v322_v45  ;;  %v321_v48 = vld [vmem:[#allocation8 + $0x60] sm:$0xff]  ;;  %v323_v49 = vld [vmem:[#allocation8 + $0x70] sm:$0xff]  ;;  %v326_v51 = vld [vmem:[#allocation8 + $0x88] sm:$0xff]  ;;  %v293_v37 = vshrl.u32 %v292_v36, 7 }
  0x55   :  { %484 = vmatmul.mubr.msk.f32.vlgmr.msra.gmra.mrb[0].mxu1 %vm98_vm1, %v86_v10  ;;  %528 = vmatprep.subr.bf16.mxu0 %v527_v35  ;;  %v537_v50 = vpack.c.bf16 %v323_v49, %v321_v48  ;;  %v328_v52 = vld [vmem:[#allocation8 + $0x98] sm:$0xff]  ;;  %v325_v54 = vld [vmem:[#allocation8 + $0x80] sm:$0xff]  ;;  %v327_v55 = vld [vmem:[#allocation8 + $0x90] sm:$0xff] }
  0x56   :  { %513 = vmatpush3.bf16.msra.mxu1 %v512_v11  ;;  %502 = vmatprep.mubr.msk.f32.mxu1 %vm700_vm0, %v701_v1  ;;  %v539_v53 = vpack.c.bf16 %v328_v52, %v326_v51  ;;  %v541_v56 = vpack.c.bf16 %v327_v55, %v325_v54  ;;  %v330_v57 = vld [vmem:[#allocation8 + $0xa8] sm:$0xff]  ;;  %v332_v58 = vld [vmem:[#allocation8 + $0xb8] sm:$0xff]  ;;  %v329_v60 = vld [vmem:[#allocation8 + $0xa0] sm:$0xff]  ;;  %v294_v39 = vsub.s32 0, %v293_v37 }
  0x57   :  { %514 = vmatprep.subr.bf16.mxu1 %v699_v0  ;;  %v543_v59 = vpack.c.bf16 %v332_v58, %v330_v57  ;;  %v331_v61 = vld [vmem:[#allocation8 + $0xb0] sm:$0xff]  ;;  %v334_v63 = vld [vmem:[#allocation8 + $0xc8] sm:$0xff]  ;;  %v333_v2 = vld [vmem:[#allocation8 + $0xc0] sm:$0xff] }
  0x58   :  { %530 = vmatpush1.bf16.msra.mxu0 %v529_v38  ;;  %v545_v62 = vpack.c.bf16 %v331_v61, %v329_v60  ;;  %v335_v3 = vld [vmem:[#allocation8 + $0xd0] sm:$0xff]  ;;  %v338_v5 = vld [vmem:[#allocation8 + $0xe8] sm:$0xff]  ;;  %v340_v6 = vld [vmem:[#allocation8 + $0xf8] sm:$0xff] }
  0x59   :  { %532 = vmatprep.subr.bf16.mxu0 %v531_v41  ;;  %v549_v4 = vpack.c.bf16 %v335_v3, %v333_v2  ;;  %v337_v7 = vld [vmem:[#allocation8 + $0xe0] sm:$0xff]  ;;  %v551_v8 = vpack.c.bf16 %v340_v6, %v338_v5  ;;  %v339_v9 = vld [vmem:[#allocation8 + $0xf0] sm:$0xff]  ;;  %v457_v11 = vld [vmem:[%s840_s4] ss:$0 sm:$0xff] }
  0x5a   :  { %516 = vmatpush3.bf16.msra.mxu1 %v515_v14  ;;  %v553_v10 = vpack.c.bf16 %v339_v9, %v337_v7  ;;  %v286_v38 = vld [vmem:[%s841_s5] sm:$0x1]  ;;  %s702_s5 = smov [#allocation10]  }
  0x5b   :  { %517 = vmatprep.subr.bf16.mxu1 %v699_v0  ;;  %v341_v49 = vld [vmem:[%s844_s8] sm:$0x3] }
  0x5c   :  { %534 = vmatpush1.bf16.msra.mxu0 %v533_v44  ;;  %v459_v44 = vld [vmem:[%s842_s6] ss:$0 sm:$0xff]  ;;  %v346_v51 = vrot.slane %v341_v49, %v294_v39  ;;  %s444_s6 = sshll.u32 %s702_s5, 4  ;;  %s445_s6 = int_to_ptr.vmem [resolvable:$true] %s444_s6 }
  0x5d   :  { %536 = vmatprep.subr.bf16.mxu0 %v535_v47  ;;  %s661_s25 = scalar_lea.vmem %s445_s6, 64  ;;  %p666_p5 = scmp.lt.s32.totalorder %s445_s6, %s445_s6 }
  0x5e   :  { %519 = vmatpush3.bf16.msra.mxu1 %v518_v17  ;;  %p662_p4 = scmp.ne.s32.totalorder %s445_s6, %s661_s25  ;;  %p667_p6 = scmp.lt.s32.totalorder %s661_s25, %s661_s25 }
  0x5f   :  { %520 = vmatprep.subr.bf16.mxu1 %v699_v0  ;;  %v336_v0 = vld [vmem:[#allocation8 + $0xd8] sm:$0xff] }
  0x60   :  { %538 = vmatpush1.bf16.msra.mxu0 %v537_v50  ;;  %v547_v1 = vpack.c.bf16 %v336_v0, %v334_v63  ;;  %v349_v50 = vsub.s32 1, %v293_v37  ;;  %p668_p7 = por %p667_p6, %p666_p5 }
  0x61   :  { %540 = vmatprep.subr.bf16.mxu0 %v539_v53 }
  0x62   :  { %522 = vmatpush3.bf16.msra.mxu1 %v521_v20  ;;  %v350_v52 = vrot.slane %v341_v49, %v349_v50  ;;  %p669_p8 = pnand %p668_p7, %p662_p4 }
  0x64   :  { %542 = vmatpush1.bf16.msra.mxu0 %v541_v56 }
  0x65   :  { %544 = vmatprep.subr.bf16.mxu0 %v543_v59 }
  0x68   :  { %546 = vmatpush1.bf16.msra.mxu0 %v545_v62 }
  0x69   :  { %548 = vmatprep.subr.bf16.mxu0 %v547_v1 }
  0x6c   :  { %550 = vmatpush1.bf16.msra.mxu0 %v549_v4 }
  0x6d   :  { %552 = vmatprep.subr.bf16.mxu0 %v551_v8 }
  0x70   :  { %554 = vmatpush1.bf16.msra.mxu0 %v553_v10 }
 0x128   :  { %v168_v22 = vpop.f32.mrb[0].mxu1 }
 0x129   :  { %v169_v23 = vadd.f32 %v455_v21, %v168_v22  ;;  %v485_v24 = vpop.f32.mrb[1].mxu1 }
 0x12b   :  { %vm172_vm2 = vcmp.gt.f32.partialorder %v169_v23, 0.0  ;;  %v173_v25 = vmul.f32 0.2, %v169_v23 }
 0x12d   :  { %v174_v26 = vsel %vm172_vm2, %v169_v23, %v173_v25 }
 0x12e   :  { %503 = vmatmul.mubr.msk.f32.vlgmr.msra.gmra.mrb[2].mxu1 %vm190_vm3, %v174_v26 }
 0x201   :  { %v260_v12 = vpop.f32.mrb[2].mxu1 }
 0x202   :  { %v261_v13 = vadd.f32 %v457_v11, %v260_v12  ;;  %v504_v14 = vpop.f32.mrb[3].mxu1 }
 0x204   :  { %v265_v15 = vsel %vm264_vm4, %v261_v13, 0.0  ;;  %v274_v16 = vmul.f32 %v261_v13, %v261_v13 }
 0x205   :  { %v266_v17 = vrot.slane %v265_v15, 4 }
 0x206   :  { %v275_v18 = vsel %vm264_vm4, %v274_v16, 0.0 }
 0x207   :  { %v267_v19 = vadd.f32 %v266_v17, %v265_v15  ;;  %v276_v20 = vrot.slane %v275_v18, 4 }
 0x209   :  { %v268_v21 = vrot.slane %v267_v19, 2  ;;  %v277_v22 = vadd.f32 %v276_v20, %v275_v18 }
 0x20b   :  { %v269_v23 = vadd.f32 %v268_v21, %v267_v19  ;;  %v278_v24 = vrot.slane %v277_v22, 2 }
 0x20d   :  { %v270_v25 = vrot.slane %v269_v23, 1  ;;  %v279_v26 = vadd.f32 %v278_v24, %v277_v22 }
 0x20f   :  { %v271_v27 = vadd.f32 %v270_v25, %v269_v23  ;;  %v280_v28 = vrot.slane %v279_v26, 1 }
 0x211   :  { %v273_v29 = vmul.f32 0.5, %v271_v27  ;;  %v281_v30 = vadd.f32 %v280_v28, %v279_v26 }
 0x213   :  { %v282_v31 = vmul.f32 0.5, %v281_v30  ;;  %v283_v32 = vmul.f32 %v273_v29, %v273_v29  ;;  %v290_v42 = vsub.f32 %v261_v13, %v273_v29 }
 0x215   :  { %v284_v33 = vsub.f32 %v282_v31, %v283_v32 }
 0x217   :  { %v285_v34 = vmax.f32 %v284_v33, 0.0 }
 0x219   :  { %v287_v35 = vadd.f32 1e-05, %v285_v34 }
 0x21b   :  { %567 = vrsqrt.f32 %v287_v35 }
 0x225   :  { %v568_v40 = vpop.eup %567 }
 0x226   :  { %v289_v41 = vmul.f32 %v568_v40, %v286_v38 }
 0x228   :  { %v295_v43 = vrot.slane %v289_v41, %v294_v39 }
 0x22a   :  { %v297_v45 = vmul.f32 %v295_v43, %v290_v42 }
 0x22c   :  { %v305_v46 = vadd.f32 %v459_v44, %v297_v45 }
 0x22e   :  { %vm306_vm5 = vcmp.gt.f32.partialorder %v305_v46, 0.0  ;;  %v307_v47 = vmul.f32 0.2, %v305_v46 }
 0x230   :  { %v308_v48 = vsel %vm306_vm5, %v305_v46, %v307_v47 }
 0x231   :  { %418 = vmatmul.mubr.f32.vlgmr.msra.gmra.mrb[0].mxu0 %v308_v48 }
 0x304   :  { %v419_v53 = vpop.f32.mrb[0].mxu0 }
 0x305   :  { %v420_v54 = vadd.f32 %v419_v53, %v346_v51  ;;  %v421_v55 = vpop.f32.mrb[1].mxu0 }
 0x306   :  { %v422_v56 = vadd.f32 %v421_v55, %v350_v52 }
 0x307   :  { %569 = vtanh.f32 %v420_v54 }
 0x308   :  { %571 = vtanh.f32 %v422_v56 }
 0x311   :  { %v570_v57 = vpop.eup %569 }
 0x312   :  { %v572_v58 = vpop.eup %571 }
 0x313   :  { %v428_v59 = vcombine.low %v570_v57, %v572_v58 }
 0x315   :  { %460 = vst.sshfl [vmem:[#allocation10] sm:$0x33 pattern:$0x76325410] %v428_v59 }
 0x316   :  { %672 = shalt.err (!%p669_p8)
}
 0x317   :  { %s673_s24 = scalar_lea.hbm %s845_s9, 64 }
 0x318   :  { %p674_p9 = scmp.ne.s32.totalorder %s845_s9, %s673_s24  ;;  %p677_p10 = scmp.lt.u32.totalorder %s673_s24, %s845_s9 }
 0x31a   :  { %p679_p11 = pnand %p677_p10, %p674_p9 }
 0x31c   :  { %682 = shalt.err (!%p679_p11)
}
 0x31d   :  { %447 = dma.vmem_to_hbm [thread:$0]  %s445_s6, 64, %s845_s9, [#allocation4]  }
 0x31e   :  { %689 = dma.done.wait [#allocation4], 64  }
 0x31f   :  { %690 = vsyncadd [#allocation4], 4294967232 }
 0x320   :  { %451 = vsyncpa [#allocation3], 1 }
 0x321   :  { %452 = vsyncpa [#allocation6], 1 }
 0x322   :  { %453 = vsyncpa [#allocation9], 1 }
 0x323   :  { %454 = vsyncpa [#allocation4], 1 }

</bundles_post_ra>
